<compile_context>
chip_gen: v6e
topology: v6e:2x2x1
jax: 0.10.0
libtpu: 0.0.40
codegen_flags: <defaults>
</compile_context>

<pallas_src>
import jax
import jax.numpy as jnp
from jax import lax
from jax.experimental import pallas as pl
from jax.experimental.pallas import tpu as pltpu

HIDDEN = 64
N_HIDDEN_LAYERS = 7  # number of additional (64 -> 64) Linear+ReLU blocks

# NT contraction: lhs (m, k) . rhs (n, k) -> (m, n)   (contract last dim of both)
_NT_DIMS = (((1,), (1,)), ((), ()))


def mlp_kernel(x_ref, w0t_ref, b0_ref, wht_ref, bh_ref, wo_ref, bo_ref, o_ref):
    #   x_ref : (bm, in_size)  f32   natural-layout batch tile
    #   w0t_ref: (HIDDEN, in_size) bf16   W0^T
    #   b0_ref : (HIDDEN, 1)  f32
    #   wht_ref: (7, HIDDEN, HIDDEN) bf16  stacked Wi^T
    #   bh_ref : (7, HIDDEN, 1) f32
    #   wo_ref : (HIDDEN, 1)  f32   output weight column (used on VPU)
    #   bo_ref : (1,) f32 scalar in SMEM
    #   o_ref  : (1, bm) f32  lane-dense output row
    x_bf16 = x_ref[...].astype(jnp.bfloat16)
    # First layer: fold the transpose into the matmul (NT form), -> (HIDDEN, bm).
    h = lax.dot_general(w0t_ref[...], x_bf16, dimension_numbers=_NT_DIMS,
                        preferred_element_type=jnp.float32)
    h = jnp.maximum(h + b0_ref[...], 0.0)                      # f32 (64, bm)
    for i in range(N_HIDDEN_LAYERS):                           # static unroll; bf16 MXU GEMMs
        h = jnp.dot(wht_ref[i], h.astype(jnp.bfloat16),
                    preferred_element_type=jnp.float32)
        h = jnp.maximum(h + bh_ref[i], 0.0)
    # Final (64 -> 1) layer: VPU multiply + cross-sublane reduce (XLU), f32,
    # directly producing the lane-dense (1, bm) row.
    z = jnp.sum(h * wo_ref[...], axis=0, keepdims=True) + bo_ref[0]
    o_ref[...] = jax.nn.sigmoid(z)


def _vmem_capacity_bytes():
    try:
        return int(pltpu.get_tpu_info().vmem_capacity_bytes)
    except Exception:
        return 64 << 20  # conservative (v7x per-TC VMEM)


def _pick_bm(B, in_size):
    """Batch-tile heuristic: large lane-dense tiles, minimal padding, even #tiles."""
    row_bytes = 4 * max(in_size, 1)
    budget = max(_vmem_capacity_bytes() // 8, 4 << 20)   # double-buffered x-tile budget
    cap = budget // (2 * row_bytes)
    cap = max(128, min(4096, (cap // 128) * 128))
    if B <= cap:
        # Mid-size batches: split into 2 balanced tiles so the "parallel" axis
        # can use both v7x TensorCores (bm must stay a multiple of 128).
        if B >= 1024 and B % 256 == 0:
            return B // 2
        return B
    # Multi-tile: bm multiple of 128, <= cap.  Cost ~ padded rows + ~128 rows of
    # per-step overhead per tile; prefer an even number of tiles, then larger bm.
    best_bm, best_key = None, None
    for bm in range(cap, 127, -128):
        n = -(-B // bm)
        cost = n * bm + n * 128
        key = (cost, 0 if n % 2 == 0 else 1, -bm)
        if best_key is None or key < best_key:
            best_key, best_bm = key, bm
    return best_bm


def mlp_forward(x, params, *, bm=None):
    """x: (B, input_size) float32.  Returns (B, 1) float32 sigmoid outputs."""
    w0, b0, wh, bh, wo, bo = params
    B, in_size = x.shape

    if bm is None:
        bm = _pick_bm(B, in_size)
    bm = int(min(bm, B))
    if bm < B:
        bm = max(128, (bm // 128) * 128)   # multi-tile: lane dim must be %128
    B_pad = pl.cdiv(B, bm) * bm
    if B_pad != B:
        x = jnp.pad(x, ((0, B_pad - B), (0, 0)))   # only on ragged multi-tile cases

    # Weight prep (tiny arrays; matmul operands pre-cast to bf16).
    w0t = w0.T.astype(jnp.bfloat16)                          # (HIDDEN, in_size)
    wht = jnp.transpose(wh, (0, 2, 1)).astype(jnp.bfloat16)  # (7, HIDDEN, HIDDEN)
    b0c = b0[:, None]                                        # (HIDDEN, 1) f32
    bhc = bh[:, :, None]                                     # (7, HIDDEN, 1) f32

    # VMEM estimate -> only raise the limit for large-in_size configs.
    est_vmem = (2 * bm * in_size * 4                                  # x tile (dbl-buffered)
                + 2 * (HIDDEN * in_size * 2 + N_HIDDEN_LAYERS * HIDDEN * HIDDEN * 2)
                + 2 * bm * 4                                          # output row
                + 6 * HIDDEN * bm * 4)                                # live f32 activations
    vmem_limit = None
    if est_vmem > (16 << 20):
        vmem_limit = min(int(est_vmem * 3 // 2), _vmem_capacity_bytes() - (2 << 20))

    grid = (B_pad // bm,)
    out = pl.pallas_call(
        mlp_kernel,
        out_shape=jax.ShapeDtypeStruct((1, B_pad), jnp.float32),
        grid_spec=pltpu.PrefetchScalarGridSpec(
            num_scalar_prefetch=0,
            grid=grid,
            in_specs=[
                pl.BlockSpec((bm, in_size), lambda i: (i, 0)),                    # x tile (natural)
                pl.BlockSpec((HIDDEN, in_size), lambda i: (0, 0)),                # W0^T (bf16)
                pl.BlockSpec((HIDDEN, 1), lambda i: (0, 0)),                      # b0 column
                pl.BlockSpec((N_HIDDEN_LAYERS, HIDDEN, HIDDEN),
                             lambda i: (0, 0, 0)),                                # stacked W^T (bf16)
                pl.BlockSpec((N_HIDDEN_LAYERS, HIDDEN, 1), lambda i: (0, 0, 0)),  # stacked b cols
                pl.BlockSpec((HIDDEN, 1), lambda i: (0, 0)),                      # W_out column
                pl.BlockSpec(memory_space=pltpu.MemorySpace.SMEM),                # b_out scalar
            ],
            out_specs=pl.BlockSpec((1, bm), lambda i: (0, i)),                    # lane-dense row
        ),
        compiler_params=pltpu.CompilerParams(
            dimension_semantics=("parallel",),
            vmem_limit_bytes=vmem_limit),
    )(x, w0t, b0c, wht, bhc, wo, bo)

    return out.reshape(B_pad, 1)[:B]


def init_params(key, input_size):
    """Deterministic init mimicking nn.Linear's uniform(-1/sqrt(fan_in), 1/sqrt(fan_in))."""
    ks = jax.random.split(key, 2 + N_HIDDEN_LAYERS)

    def lin(k, fan_in, fan_out):
        bound = 1.0 / jnp.sqrt(jnp.float32(fan_in))
        kw, kb = jax.random.split(k)
        w = jax.random.uniform(kw, (fan_in, fan_out), jnp.float32, -bound, bound)
        b = jax.random.uniform(kb, (fan_out,), jnp.float32, -bound, bound)
        return w, b

    w0, b0 = lin(ks[0], input_size, HIDDEN)
    wh_list, bh_list = [], []
    for i in range(N_HIDDEN_LAYERS):
        w, b = lin(ks[1 + i], HIDDEN, HIDDEN)
        wh_list.append(w)
        bh_list.append(b)
    wh = jnp.stack(wh_list)            # (7, 64, 64)
    bh = jnp.stack(bh_list)            # (7, 64)
    wo, bo = lin(ks[-1], HIDDEN, 1)
    return w0, b0, wh, bh, wo, bo


def mlp_reference(x, params):
    """Plain-JAX f32 reference of the same forward pass (PyTorch semantics)."""
    w0, b0, wh, bh, wo, bo = params
    h = jnp.maximum(x @ w0 + b0, 0.0)
    for i in range(N_HIDDEN_LAYERS):
        h = jnp.maximum(h @ wh[i] + bh[i], 0.0)
    return jax.nn.sigmoid(h @ wo + bo)


if __name__ == "__main__":
    key = jax.random.PRNGKey(0)
    k_x, k_p, k_x2, k_x3, k_x4 = jax.random.split(key, 5)

    # bf16 matmul chain vs f32 reference -> loose tolerance.
    TOL = dict(atol=2e-2, rtol=2e-2)

    # Primary small-shape check (matches the module's expected usage).
    batch, input_size = 8, 32
    params = init_params(k_p, input_size)
    x = jax.random.normal(k_x, (batch, input_size), jnp.float32)
    out = jax.block_until_ready(mlp_forward(x, params))
    ref = mlp_reference(x, params)
    assert out.shape == (batch, 1)
    assert jnp.allclose(out, ref, **TOL)

    # Multi-tile path (grid > 1, exact tiling).
    x2 = jax.random.normal(k_x2, (384, input_size), jnp.float32)
    out2 = jax.block_until_ready(mlp_forward(x2, params, bm=128))
    assert jnp.allclose(out2, mlp_reference(x2, params), **TOL)

    # Padded path (B not a multiple of bm).
    x3 = jax.random.normal(k_x3, (200, input_size), jnp.float32)
    out3 = jax.block_until_ready(mlp_forward(x3, params, bm=128))
    assert out3.shape == (200, 1)
    assert jnp.allclose(out3, mlp_reference(x3, params), **TOL)

    # Auto-bm path: mid-size batch splits into 2 balanced tiles (v7x 2-TC friendly).
    x4 = jax.random.normal(k_x4, (2048, input_size), jnp.float32)
    out4 = jax.block_until_ready(mlp_forward(x4, params))
    assert jnp.allclose(out4, mlp_reference(x4, params), **TOL)

    print("KERNEL_OK")
</pallas_src>

<mosaic_0001>
module attributes {stable_mosaic.version = 11 : i64} {
  func.func @mlp_kernel(%arg0: i32, %arg1: memref<8x32xf32, #tpu.memory_space<vmem>>, %arg2: memref<64x32xbf16, #tpu.memory_space<vmem>>, %arg3: memref<64x1xf32, #tpu.memory_space<vmem>>, %arg4: memref<7x64x64xbf16, #tpu.memory_space<vmem>>, %arg5: memref<7x64x1xf32, #tpu.memory_space<vmem>>, %arg6: memref<64x1xf32, #tpu.memory_space<vmem>>, %arg7: memref<1xf32, #tpu.memory_space<smem>>, %arg8: memref<1x8xf32, #tpu.memory_space<vmem>>) attributes {dimension_semantics = [#tpu.dimension_semantics<parallel>], iteration_bounds = array<i64: 1>, scalar_prefetch = 0 : i64, scratch_operands = 0 : i64, tpu.core_type = #tpu.core_type<tc>, window_params = [{transform_indices = @transform_0, window_bounds = array<i64: 8, 32>}, {pipeline_mode = #tpu.pipeline_mode<synchronous>, transform_indices = @transform_1, window_bounds = array<i64: 64, 32>}, {pipeline_mode = #tpu.pipeline_mode<synchronous>, transform_indices = @transform_2, window_bounds = array<i64: 64, 1>}, {pipeline_mode = #tpu.pipeline_mode<synchronous>, transform_indices = @transform_3, window_bounds = array<i64: 7, 64, 64>}, {pipeline_mode = #tpu.pipeline_mode<synchronous>, transform_indices = @transform_4, window_bounds = array<i64: 7, 64, 1>}, {pipeline_mode = #tpu.pipeline_mode<synchronous>, transform_indices = @transform_5, window_bounds = array<i64: 64, 1>}, {transform_indices = @transform_6, window_bounds = array<i64: 1>}, {transform_indices = @transform_7, window_bounds = array<i64: 1, 8>}]} {
    %c0 = arith.constant 0 : index
    %c0_0 = arith.constant 0 : index
    %0 = vector.load %arg1[%c0, %c0_0] : memref<8x32xf32, #tpu.memory_space<vmem>>, vector<8x32xf32>
    %1 = arith.truncf %0 : vector<8x32xf32> to vector<8x32xbf16>
    %c0_1 = arith.constant 0 : index
    %c0_2 = arith.constant 0 : index
    %2 = vector.load %arg2[%c0_1, %c0_2] : memref<64x32xbf16, #tpu.memory_space<vmem>>, vector<64x32xbf16>
    %cst = arith.constant dense<0.000000e+00> : vector<64x8xf32>
    %3 = tpu.matmul %2, %1, %cst {dimension_numbers = #tpu.dot_dimension_numbers<[1], [1], [0], [0], [0, 0, 1, 0], [], []>} : vector<64x32xbf16>, vector<8x32xbf16>, vector<64x8xf32> -> vector<64x8xf32>
    %c0_3 = arith.constant 0 : index
    %c0_4 = arith.constant 0 : index
    %4 = vector.load %arg3[%c0_3, %c0_4] : memref<64x1xf32, #tpu.memory_space<vmem>>, vector<64x1xf32>
    %5 = vector.broadcast %4 : vector<64x1xf32> to vector<64x8xf32>
    %6 = arith.addf %3, %5 : vector<64x8xf32>
    %cst_5 = arith.constant 0.000000e+00 : f32
    %7 = vector.broadcast %cst_5 : f32 to vector<64x8xf32>
    %8 = arith.maximumf %6, %7 : vector<64x8xf32>
    %c0_6 = arith.constant 0 : index
    %c0_7 = arith.constant 0 : index
    %c0_8 = arith.constant 0 : index
    %9 = vector.load %arg4[%c0_6, %c0_7, %c0_8] : memref<7x64x64xbf16, #tpu.memory_space<vmem>>, vector<1x64x64xbf16>
    %10 = vector.shape_cast %9 : vector<1x64x64xbf16> to vector<64x64xbf16>
    %11 = arith.truncf %8 : vector<64x8xf32> to vector<64x8xbf16>
    %cst_9 = arith.constant dense<0.000000e+00> : vector<64x8xf32>
    %12 = tpu.matmul %10, %11, %cst_9 {dimension_numbers = #tpu.dot_dimension_numbers<[1], [0], [0], [1], [0, 0, 1, 1], [], []>} : vector<64x64xbf16>, vector<64x8xbf16>, vector<64x8xf32> -> vector<64x8xf32>
    %c0_10 = arith.constant 0 : index
    %c0_11 = arith.constant 0 : index
    %c0_12 = arith.constant 0 : index
    %13 = vector.load %arg5[%c0_10, %c0_11, %c0_12] : memref<7x64x1xf32, #tpu.memory_space<vmem>>, vector<1x64x1xf32>
    %14 = vector.shape_cast %13 : vector<1x64x1xf32> to vector<64x1xf32>
    %15 = vector.broadcast %14 : vector<64x1xf32> to vector<64x8xf32>
    %16 = arith.addf %12, %15 : vector<64x8xf32>
    %cst_13 = arith.constant 0.000000e+00 : f32
    %17 = vector.broadcast %cst_13 : f32 to vector<64x8xf32>
    %18 = arith.maximumf %16, %17 : vector<64x8xf32>
    %c1 = arith.constant 1 : index
    %c0_14 = arith.constant 0 : index
    %c0_15 = arith.constant 0 : index
    %19 = vector.load %arg4[%c1, %c0_14, %c0_15] : memref<7x64x64xbf16, #tpu.memory_space<vmem>>, vector<1x64x64xbf16>
    %20 = vector.shape_cast %19 : vector<1x64x64xbf16> to vector<64x64xbf16>
    %21 = arith.truncf %18 : vector<64x8xf32> to vector<64x8xbf16>
    %cst_16 = arith.constant dense<0.000000e+00> : vector<64x8xf32>
    %22 = tpu.matmul %20, %21, %cst_16 {dimension_numbers = #tpu.dot_dimension_numbers<[1], [0], [0], [1], [0, 0, 1, 1], [], []>} : vector<64x64xbf16>, vector<64x8xbf16>, vector<64x8xf32> -> vector<64x8xf32>
    %c1_17 = arith.constant 1 : index
    %c0_18 = arith.constant 0 : index
    %c0_19 = arith.constant 0 : index
    %23 = vector.load %arg5[%c1_17, %c0_18, %c0_19] : memref<7x64x1xf32, #tpu.memory_space<vmem>>, vector<1x64x1xf32>
    %24 = vector.shape_cast %23 : vector<1x64x1xf32> to vector<64x1xf32>
    %25 = vector.broadcast %24 : vector<64x1xf32> to vector<64x8xf32>
    %26 = arith.addf %22, %25 : vector<64x8xf32>
    %cst_20 = arith.constant 0.000000e+00 : f32
    %27 = vector.broadcast %cst_20 : f32 to vector<64x8xf32>
    %28 = arith.maximumf %26, %27 : vector<64x8xf32>
    %c2 = arith.constant 2 : index
    %c0_21 = arith.constant 0 : index
    %c0_22 = arith.constant 0 : index
    %29 = vector.load %arg4[%c2, %c0_21, %c0_22] : memref<7x64x64xbf16, #tpu.memory_space<vmem>>, vector<1x64x64xbf16>
    %30 = vector.shape_cast %29 : vector<1x64x64xbf16> to vector<64x64xbf16>
    %31 = arith.truncf %28 : vector<64x8xf32> to vector<64x8xbf16>
    %cst_23 = arith.constant dense<0.000000e+00> : vector<64x8xf32>
    %32 = tpu.matmul %30, %31, %cst_23 {dimension_numbers = #tpu.dot_dimension_numbers<[1], [0], [0], [1], [0, 0, 1, 1], [], []>} : vector<64x64xbf16>, vector<64x8xbf16>, vector<64x8xf32> -> vector<64x8xf32>
    %c2_24 = arith.constant 2 : index
    %c0_25 = arith.constant 0 : index
    %c0_26 = arith.constant 0 : index
    %33 = vector.load %arg5[%c2_24, %c0_25, %c0_26] : memref<7x64x1xf32, #tpu.memory_space<vmem>>, vector<1x64x1xf32>
    %34 = vector.shape_cast %33 : vector<1x64x1xf32> to vector<64x1xf32>
    %35 = vector.broadcast %34 : vector<64x1xf32> to vector<64x8xf32>
    %36 = arith.addf %32, %35 : vector<64x8xf32>
    %cst_27 = arith.constant 0.000000e+00 : f32
    %37 = vector.broadcast %cst_27 : f32 to vector<64x8xf32>
    %38 = arith.maximumf %36, %37 : vector<64x8xf32>
    %c3 = arith.constant 3 : index
    %c0_28 = arith.constant 0 : index
    %c0_29 = arith.constant 0 : index
    %39 = vector.load %arg4[%c3, %c0_28, %c0_29] : memref<7x64x64xbf16, #tpu.memory_space<vmem>>, vector<1x64x64xbf16>
    %40 = vector.shape_cast %39 : vector<1x64x64xbf16> to vector<64x64xbf16>
    %41 = arith.truncf %38 : vector<64x8xf32> to vector<64x8xbf16>
    %cst_30 = arith.constant dense<0.000000e+00> : vector<64x8xf32>
    %42 = tpu.matmul %40, %41, %cst_30 {dimension_numbers = #tpu.dot_dimension_numbers<[1], [0], [0], [1], [0, 0, 1, 1], [], []>} : vector<64x64xbf16>, vector<64x8xbf16>, vector<64x8xf32> -> vector<64x8xf32>
    %c3_31 = arith.constant 3 : index
    %c0_32 = arith.constant 0 : index
    %c0_33 = arith.constant 0 : index
    %43 = vector.load %arg5[%c3_31, %c0_32, %c0_33] : memref<7x64x1xf32, #tpu.memory_space<vmem>>, vector<1x64x1xf32>
    %44 = vector.shape_cast %43 : vector<1x64x1xf32> to vector<64x1xf32>
    %45 = vector.broadcast %44 : vector<64x1xf32> to vector<64x8xf32>
    %46 = arith.addf %42, %45 : vector<64x8xf32>
    %cst_34 = arith.constant 0.000000e+00 : f32
    %47 = vector.broadcast %cst_34 : f32 to vector<64x8xf32>
    %48 = arith.maximumf %46, %47 : vector<64x8xf32>
    %c4 = arith.constant 4 : index
    %c0_35 = arith.constant 0 : index
    %c0_36 = arith.constant 0 : index
    %49 = vector.load %arg4[%c4, %c0_35, %c0_36] : memref<7x64x64xbf16, #tpu.memory_space<vmem>>, vector<1x64x64xbf16>
    %50 = vector.shape_cast %49 : vector<1x64x64xbf16> to vector<64x64xbf16>
    %51 = arith.truncf %48 : vector<64x8xf32> to vector<64x8xbf16>
    %cst_37 = arith.constant dense<0.000000e+00> : vector<64x8xf32>
    %52 = tpu.matmul %50, %51, %cst_37 {dimension_numbers = #tpu.dot_dimension_numbers<[1], [0], [0], [1], [0, 0, 1, 1], [], []>} : vector<64x64xbf16>, vector<64x8xbf16>, vector<64x8xf32> -> vector<64x8xf32>
    %c4_38 = arith.constant 4 : index
    %c0_39 = arith.constant 0 : index
    %c0_40 = arith.constant 0 : index
    %53 = vector.load %arg5[%c4_38, %c0_39, %c0_40] : memref<7x64x1xf32, #tpu.memory_space<vmem>>, vector<1x64x1xf32>
    %54 = vector.shape_cast %53 : vector<1x64x1xf32> to vector<64x1xf32>
    %55 = vector.broadcast %54 : vector<64x1xf32> to vector<64x8xf32>
    %56 = arith.addf %52, %55 : vector<64x8xf32>
    %cst_41 = arith.constant 0.000000e+00 : f32
    %57 = vector.broadcast %cst_41 : f32 to vector<64x8xf32>
    %58 = arith.maximumf %56, %57 : vector<64x8xf32>
    %c5 = arith.constant 5 : index
    %c0_42 = arith.constant 0 : index
    %c0_43 = arith.constant 0 : index
    %59 = vector.load %arg4[%c5, %c0_42, %c0_43] : memref<7x64x64xbf16, #tpu.memory_space<vmem>>, vector<1x64x64xbf16>
    %60 = vector.shape_cast %59 : vector<1x64x64xbf16> to vector<64x64xbf16>
    %61 = arith.truncf %58 : vector<64x8xf32> to vector<64x8xbf16>
    %cst_44 = arith.constant dense<0.000000e+00> : vector<64x8xf32>
    %62 = tpu.matmul %60, %61, %cst_44 {dimension_numbers = #tpu.dot_dimension_numbers<[1], [0], [0], [1], [0, 0, 1, 1], [], []>} : vector<64x64xbf16>, vector<64x8xbf16>, vector<64x8xf32> -> vector<64x8xf32>
    %c5_45 = arith.constant 5 : index
    %c0_46 = arith.constant 0 : index
    %c0_47 = arith.constant 0 : index
    %63 = vector.load %arg5[%c5_45, %c0_46, %c0_47] : memref<7x64x1xf32, #tpu.memory_space<vmem>>, vector<1x64x1xf32>
    %64 = vector.shape_cast %63 : vector<1x64x1xf32> to vector<64x1xf32>
    %65 = vector.broadcast %64 : vector<64x1xf32> to vector<64x8xf32>
    %66 = arith.addf %62, %65 : vector<64x8xf32>
    %cst_48 = arith.constant 0.000000e+00 : f32
    %67 = vector.broadcast %cst_48 : f32 to vector<64x8xf32>
    %68 = arith.maximumf %66, %67 : vector<64x8xf32>
    %c6 = arith.constant 6 : index
    %c0_49 = arith.constant 0 : index
    %c0_50 = arith.constant 0 : index
    %69 = vector.load %arg4[%c6, %c0_49, %c0_50] : memref<7x64x64xbf16, #tpu.memory_space<vmem>>, vector<1x64x64xbf16>
    %70 = vector.shape_cast %69 : vector<1x64x64xbf16> to vector<64x64xbf16>
    %71 = arith.truncf %68 : vector<64x8xf32> to vector<64x8xbf16>
    %cst_51 = arith.constant dense<0.000000e+00> : vector<64x8xf32>
    %72 = tpu.matmul %70, %71, %cst_51 {dimension_numbers = #tpu.dot_dimension_numbers<[1], [0], [0], [1], [0, 0, 1, 1], [], []>} : vector<64x64xbf16>, vector<64x8xbf16>, vector<64x8xf32> -> vector<64x8xf32>
    %c6_52 = arith.constant 6 : index
    %c0_53 = arith.constant 0 : index
    %c0_54 = arith.constant 0 : index
    %73 = vector.load %arg5[%c6_52, %c0_53, %c0_54] : memref<7x64x1xf32, #tpu.memory_space<vmem>>, vector<1x64x1xf32>
    %74 = vector.shape_cast %73 : vector<1x64x1xf32> to vector<64x1xf32>
    %75 = vector.broadcast %74 : vector<64x1xf32> to vector<64x8xf32>
    %76 = arith.addf %72, %75 : vector<64x8xf32>
    %cst_55 = arith.constant 0.000000e+00 : f32
    %77 = vector.broadcast %cst_55 : f32 to vector<64x8xf32>
    %78 = arith.maximumf %76, %77 : vector<64x8xf32>
    %c0_56 = arith.constant 0 : index
    %c0_57 = arith.constant 0 : index
    %79 = vector.load %arg6[%c0_56, %c0_57] : memref<64x1xf32, #tpu.memory_space<vmem>>, vector<64x1xf32>
    %80 = vector.broadcast %79 : vector<64x1xf32> to vector<64x8xf32>
    %81 = arith.mulf %78, %80 : vector<64x8xf32>
    %cst_58 = arith.constant dense<0.000000e+00> : vector<8xf32>
    %82 = vector.multi_reduction <add>, %81, %cst_58 [0] : vector<64x8xf32> to vector<8xf32>
    %83 = vector.shape_cast %82 : vector<8xf32> to vector<1x8xf32>
    %c0_59 = arith.constant 0 : index
    %84 = memref.load %arg7[%c0_59] : memref<1xf32, #tpu.memory_space<smem>>
    %85 = vector.broadcast %84 : f32 to vector<1x8xf32>
    %86 = arith.addf %83, %85 : vector<1x8xf32>
    %87 = arith.negf %86 : vector<1x8xf32>
    %88 = math.exp %87 : vector<1x8xf32>
    %cst_60 = arith.constant 1.000000e+00 : f32
    %89 = vector.broadcast %cst_60 : f32 to vector<1x8xf32>
    %90 = arith.addf %89, %88 : vector<1x8xf32>
    %91 = arith.divf %89, %90 : vector<1x8xf32>
    %c0_61 = arith.constant 0 : index
    %c0_62 = arith.constant 0 : index
    %92 = vector.load %arg8[%c0_61, %c0_62] : memref<1x8xf32, #tpu.memory_space<vmem>>, vector<1x8xf32>
    tpu.vector_store %arg8[%c0_61, %c0_62], %91 {strides = array<i32>} : memref<1x8xf32, #tpu.memory_space<vmem>>, vector<1x8xf32>,
    return
  }
  func.func @transform_0(%arg0: i32) -> (i32, i32) {
    %c0_i32 = arith.constant 0 : i32
    %c0_i32_0 = arith.constant 0 : i32
    return %arg0, %c0_i32 : i32, i32
  }
  func.func @transform_1(%arg0: i32) -> (i32, i32) {
    %c0_i32 = arith.constant 0 : i32
    %c0_i32_0 = arith.constant 0 : i32
    %c0_i32_1 = arith.constant 0 : i32
    return %c0_i32, %c0_i32_0 : i32, i32
  }
  func.func @transform_2(%arg0: i32) -> (i32, i32) {
    %c0_i32 = arith.constant 0 : i32
    %c0_i32_0 = arith.constant 0 : i32
    %c0_i32_1 = arith.constant 0 : i32
    return %c0_i32, %c0_i32_0 : i32, i32
  }
  func.func @transform_3(%arg0: i32) -> (i32, i32, i32) {
    %c0_i32 = arith.constant 0 : i32
    %c0_i32_0 = arith.constant 0 : i32
    %c0_i32_1 = arith.constant 0 : i32
    %c0_i32_2 = arith.constant 0 : i32
    return %c0_i32, %c0_i32_0, %c0_i32_1 : i32, i32, i32
  }
  func.func @transform_4(%arg0: i32) -> (i32, i32, i32) {
    %c0_i32 = arith.constant 0 : i32
    %c0_i32_0 = arith.constant 0 : i32
    %c0_i32_1 = arith.constant 0 : i32
    %c0_i32_2 = arith.constant 0 : i32
    return %c0_i32, %c0_i32_0, %c0_i32_1 : i32, i32, i32
  }
  func.func @transform_5(%arg0: i32) -> (i32, i32) {
    %c0_i32 = arith.constant 0 : i32
    %c0_i32_0 = arith.constant 0 : i32
    %c0_i32_1 = arith.constant 0 : i32
    return %c0_i32, %c0_i32_0 : i32, i32
  }
  func.func @transform_6(%arg0: i32) -> i32 {
    %c0_i32 = arith.constant 0 : i32
    %c0_i32_0 = arith.constant 0 : i32
    return %c0_i32 : i32
  }
  func.func @transform_7(%arg0: i32) -> (i32, i32) {
    %c0_i32 = arith.constant 0 : i32
    %c0_i32_0 = arith.constant 0 : i32
    return %c0_i32, %arg0 : i32, i32
  }
}

</mosaic_0001>

<bundles_post_ra>
// kernel: tpu_custom_call.1
= control target key start
LH: loop header
LB: loop body
LE: loop exit
PB: predicated region body
PF: predicated region fallthrough
CT: control target
= control target key end

     0   :  { %vm107_vm0 = vcmask 261120   ;;  %v1874_v3 = vmov 0   ;;  %s2279_s0 = inlined_call_operand.vmem [shape: f32[8,32], index: 0, kind: input, shape index: {}]   ;;  %s2280_s1 = inlined_call_operand.vmem [shape: bf16[64,32], index: 1, kind: input, shape index: {}]   ;;  %s2281_s2 = inlined_call_operand.vmem [shape: f32[64,1], index: 2, kind: input, shape index: {}]   ;;  %s2282_s3 = inlined_call_operand.vmem [shape: bf16[7,64,64], index: 3, kind: input, shape index: {}]   ;;  %s2283_s4 = inlined_call_operand.vmem [shape: f32[7,64,1], index: 4, kind: input, shape index: {}]   ;;  %s2284_s5 = inlined_call_operand.vmem [shape: f32[64,1], index: 5, kind: input, shape index: {}]   ;;  %s2285_s6 = inlined_call_operand.<no memory space> [shape: f32[1], index: 6, kind: input, shape index: {}]   ;;  %s2286_s7 = inlined_call_operand.hbm [shape: f32[1,8], index: 7, kind: output, shape index: {}]  }
   0x1   :  { %v45_v0 = vld [vmem:[%s2281_s2 + $0x30] sm:$0xff]  ;;  %v43_v1 = vld [vmem:[%s2281_s2 + $0x20] sm:$0xff]  ;;  %1815 = vset.pattern.permute.xlu1 %v1874_v3  ;;  %1814 = vset.pattern.permute.xlu0 %v1874_v3  ;;  %v46_v5 = vld [vmem:[%s2281_s2 + $0x38] sm:$0xff] }
   0x2   :  { %v29_v2 = vld [vmem:[%s2279_s0] sm:$0xff]  ;;  %79 = vperm.xlu0 %1814, %v45_v0   ;;  %69 = vperm.xlu1 %1815, %v43_v1   ;;  %v44_v6 = vld [vmem:[%s2281_s2 + $0x28] sm:$0xff]  ;;  %v42_v9 = vld [vmem:[%s2281_s2 + $0x18] sm:$0xff] }
   0x3   :  { %v30_v4 = vpack.c.bf16 %v29_v2, %v29_v2  ;;  %v1816_v8 = vld [vmem:[%s2280_s1] sm:$0xff]   ;;  %v41_v10 = vld [vmem:[%s2281_s2 + $0x10] sm:$0xff]  ;;  %v1817_v11 = vld [vmem:[%s2280_s1 + $0x8] sm:$0xff]  }
   0x4   :  { %1691 = vmatprep.mubr.msk.bf16.mxu0 %vm107_vm0, %v1816_v8  ;;  %v1818_v12 = vld [vmem:[%s2280_s1 + $0x10] sm:$0xff]   ;;  %v40_v13 = vld [vmem:[%s2281_s2 + $0x8] sm:$0xff]  ;;  %v39_v14 = vld [vmem:[%s2281_s2] sm:$0xff] }
   0x5   :  { %1811 = vmatprep.subr.msk.bf16.mxu0 %vm107_vm0, %v30_v4  ;;  %v121_v7 = vsel %vm107_vm0, %v30_v4, 0  ;;  %v215_v15 = vld [vmem:[%s2283_s4 + $0x38] sm:$0xff]  ;;  %v214_v16 = vld [vmem:[%s2283_s4 + $0x30] sm:$0xff]  ;;  %v213_v18 = vld [vmem:[%s2283_s4 + $0x28] sm:$0xff] }
   0x6   :  { %1690 = vmatpush3.bf16.xpose.msra.mxu0 %v121_v7  ;;  %84 = vperm.xlu0 %1814, %v46_v5   ;;  %v1819_v17 = vld [vmem:[%s2280_s1 + $0x18] sm:$0xff]   ;;  %v212_v19 = vld [vmem:[%s2283_s4 + $0x20] sm:$0xff]  ;;  %v210_v21 = vld [vmem:[%s2283_s4 + $0x10] sm:$0xff] }
   0x7   :  { %74 = vperm.xlu1 %1815, %v44_v6   ;;  %v211_v20 = vld [vmem:[%s2283_s4 + $0x18] sm:$0xff]  ;;  %v209_v22 = vld [vmem:[%s2283_s4 + $0x8] sm:$0xff]  ;;  %v208_v23 = vld [vmem:[%s2283_s4] sm:$0xff] }
   0x8   :  { %v1498_v24 = vld [vmem:[%s2283_s4 + $0x78] sm:$0xff]  ;;  %v1497_v25 = vld [vmem:[%s2283_s4 + $0x70] sm:$0xff]  ;;  %v1496_v26 = vld [vmem:[%s2283_s4 + $0x68] sm:$0xff] }
   0x9   :  { %v1495_v27 = vld [vmem:[%s2283_s4 + $0x60] sm:$0xff]  ;;  %v1494_v28 = vld [vmem:[%s2283_s4 + $0x58] sm:$0xff]  ;;  %v1493_v29 = vld [vmem:[%s2283_s4 + $0x50] sm:$0xff] }
   0xa   :  { %59 = vperm.xlu0 %1814, %v41_v10   ;;  %v1492_v30 = vld [vmem:[%s2283_s4 + $0x48] sm:$0xff]  ;;  %v1491_v31 = vld [vmem:[%s2283_s4 + $0x40] sm:$0xff]  ;;  %v1522_v32 = vld [vmem:[%s2283_s4 + $0xb8] sm:$0xff] }
   0xb   :  { %64 = vperm.xlu1 %1815, %v42_v9   ;;  %v1521_v33 = vld [vmem:[%s2283_s4 + $0xb0] sm:$0xff] }
   0xd   :  { %1692 = vmatmul.mubr.msk.bf16.vlgmr.msra.gmra.mxu0 %vm107_vm0, %v1817_v11 }
   0xe   :  { %1695 = vmatprep.mubr.msk.bf16.mxu0 %vm107_vm0, %v1818_v12  ;;  %49 = vperm.xlu0 %1814, %v39_v14  }
   0xf   :  { %54 = vperm.xlu1 %1815, %v40_v13  }
  0x12   :  { %248 = vperm.xlu0 %1814, %v214_v16  }
  0x13   :  { %253 = vperm.xlu1 %1815, %v215_v15  }
  0x15   :  { %1696 = vmatmul.mubr.msk.bf16.gmra.mxu0 %vm107_vm0, %v1819_v17 }
  0x16   :  { %238 = vperm.xlu0 %1814, %v212_v19  }
  0x17   :  { %243 = vperm.xlu1 %1815, %v213_v18  }
  0x1a   :  { %228 = vperm.xlu0 %1814, %v210_v21  }
  0x1b   :  { %233 = vperm.xlu1 %1815, %v211_v20  }
  0x1e   :  { %218 = vperm.xlu0 %1814, %v208_v23  }
  0x1f   :  { %223 = vperm.xlu1 %1815, %v209_v22  }
  0x22   :  { %416 = vperm.xlu0 %1814, %v1497_v25  }
  0x23   :  { %421 = vperm.xlu1 %1815, %v1498_v24  }
  0x26   :  { %406 = vperm.xlu0 %1814, %v1495_v27  }
  0x27   :  { %411 = vperm.xlu1 %1815, %v1496_v26  }
  0x2a   :  { %396 = vperm.xlu0 %1814, %v1493_v29  }
  0x2b   :  { %401 = vperm.xlu1 %1815, %v1494_v28  }
  0x2e   :  { %386 = vperm.xlu0 %1814, %v1491_v31  }
  0x2f   :  { %391 = vperm.xlu1 %1815, %v1492_v30  }
  0x30   :  { %13 = vsyncpa [#allocation4], 0  ;;  %v1520_v34 = vld [vmem:[%s2283_s4 + $0xa8] sm:$0xff]  ;;  %v1519_v35 = vld [vmem:[%s2283_s4 + $0xa0] sm:$0xff]  ;;  %vm276_vm1 = vcmask 523264   ;;  %vm1420_vm2 = vcmask 64512  }
  0x31   :  { %v1518_v36 = vld [vmem:[%s2283_s4 + $0x98] sm:$0xff]  ;;  %v1517_v37 = vld [vmem:[%s2283_s4 + $0x90] sm:$0xff]  ;;  %v1516_v38 = vld [vmem:[%s2283_s4 + $0x88] sm:$0xff]  ;;  %s1875_s25 = smov [#allocation3]   ;;  %vm1451_vm3 = vcmask 57344  }
  0x32   :  { %583 = vperm.xlu0 %1814, %v1521_v33   ;;  %v1515_v39 = vld [vmem:[%s2283_s4 + $0x80] sm:$0xff]  ;;  %v1546_v40 = vld [vmem:[%s2283_s4 + $0xf8] sm:$0xff]  ;;  %v1545_v41 = vld [vmem:[%s2283_s4 + $0xf0] sm:$0xff] }
  0x33   :  { %588 = vperm.xlu1 %1815, %v1522_v32   ;;  %v1544_v42 = vld [vmem:[%s2283_s4 + $0xe8] sm:$0xff]  ;;  %v1543_v43 = vld [vmem:[%s2283_s4 + $0xe0] sm:$0xff]  ;;  %v1542_v44 = vld [vmem:[%s2283_s4 + $0xd8] sm:$0xff] }
  0x34   :  { %v1541_v45 = vld [vmem:[%s2283_s4 + $0xd0] sm:$0xff]  ;;  %v1540_v46 = vld [vmem:[%s2283_s4 + $0xc8] sm:$0xff]  ;;  %v1539_v47 = vld [vmem:[%s2283_s4 + $0xc0] sm:$0xff] }
  0x35   :  { %v1570_v48 = vld [vmem:[%s2283_s4 + $0x138] sm:$0xff]  ;;  %v1569_v49 = vld [vmem:[%s2283_s4 + $0x130] sm:$0xff]  ;;  %v1568_v50 = vld [vmem:[%s2283_s4 + $0x128] sm:$0xff] }
  0x36   :  { %573 = vperm.xlu0 %1814, %v1519_v35   ;;  %v1567_v51 = vld [vmem:[%s2283_s4 + $0x120] sm:$0xff]  ;;  %v1566_v52 = vld [vmem:[%s2283_s4 + $0x118] sm:$0xff]  ;;  %v1565_v53 = vld [vmem:[%s2283_s4 + $0x110] sm:$0xff] }
  0x37   :  { %578 = vperm.xlu1 %1815, %v1520_v34   ;;  %v1564_v54 = vld [vmem:[%s2283_s4 + $0x108] sm:$0xff]  ;;  %v1563_v55 = vld [vmem:[%s2283_s4 + $0x100] sm:$0xff]  ;;  %v1594_v56 = vld [vmem:[%s2283_s4 + $0x178] sm:$0xff] }
  0x38   :  { %v1593_v57 = vld [vmem:[%s2283_s4 + $0x170] sm:$0xff]  ;;  %v1592_v58 = vld [vmem:[%s2283_s4 + $0x168] sm:$0xff]  ;;  %v1591_v59 = vld [vmem:[%s2283_s4 + $0x160] sm:$0xff] }
  0x39   :  { %v1590_v60 = vld [vmem:[%s2283_s4 + $0x158] sm:$0xff]  ;;  %v1589_v61 = vld [vmem:[%s2283_s4 + $0x150] sm:$0xff]  ;;  %v1588_v62 = vld [vmem:[%s2283_s4 + $0x148] sm:$0xff] }
  0x3a   :  { %563 = vperm.xlu0 %1814, %v1517_v37   ;;  %v1587_v63 = vld [vmem:[%s2283_s4 + $0x140] sm:$0xff]  ;;  %v1612_v1 = vld [vmem:[%s2283_s4 + $0x188] sm:$0xff]  ;;  %v1614_v3 = vld [vmem:[%s2283_s4 + $0x198] sm:$0xff] }
  0x3b   :  { %568 = vperm.xlu1 %1815, %v1518_v36   ;;  %v1820_v0 = vld [vmem:[%s2282_s3] sm:$0xff]   ;;  %v1613_v4 = vld [vmem:[%s2283_s4 + $0x190] sm:$0xff]  ;;  %v1365_v5 = vld [vmem:[%s2284_s5 + $0x8] sm:$0xff] }
  0x3c   :  { %v1611_v2 = vld [vmem:[%s2283_s4 + $0x180] sm:$0xff]  ;;  %1707 = vmatprep.mubr.msk.bf16.mxu1 %vm276_vm1, %v1820_v0  ;;  %v1366_v7 = vld [vmem:[%s2284_s5 + $0x10] sm:$0xff]  ;;  %v1367_v9 = vld [vmem:[%s2284_s5 + $0x18] sm:$0xff] }
  0x3d   :  { %v1364_v6 = vld [vmem:[%s2284_s5] sm:$0xff]  ;;  %v1616_v10 = vld [vmem:[%s2283_s4 + $0x1a8] sm:$0xff]  ;;  %v1617_v12 = vld [vmem:[%s2283_s4 + $0x1b0] sm:$0xff] }
  0x3e   :  { %553 = vperm.xlu0 %1814, %v1515_v39   ;;  %v1615_v8 = vld [vmem:[%s2283_s4 + $0x1a0] sm:$0xff]  ;;  %v1369_v13 = vld [vmem:[%s2284_s5 + $0x28] sm:$0xff]  ;;  %v1618_v14 = vld [vmem:[%s2283_s4 + $0x1b8] sm:$0xff]  ;;  %s1459_s4 = sshll.u32 %s1875_s25, 4  ;;  %s1460_s4 = int_to_ptr.vmem [resolvable:$true] %s1459_s4 }
  0x3f   :  { %558 = vperm.xlu1 %1815, %v1516_v38   ;;  %v1368_v11 = vld [vmem:[%s2284_s5 + $0x20] sm:$0xff]  ;;  %v1371_v15 = vld [vmem:[%s2284_s5 + $0x38] sm:$0xff]  ;;  %v1370_v16 = vld [vmem:[%s2284_s5 + $0x30] sm:$0xff]  ;;  %s1852_s5 = scalar_lea.vmem %s1460_s4, 16  ;;  %s1856_s26 = scalar_lea.vmem %s1460_s4, 32 }
  0x40   :  { %p1853_p0 = scmp.ne.s32.totalorder %s1460_s4, %s1852_s5  ;;  %p1857_p1 = scmp.lt.s32.totalorder %s1460_s4, %s1460_s4 }
  0x41   :  { %p1858_p2 = scmp.lt.s32.totalorder %s1856_s26, %s1852_s5 }
  0x42   :  { %750 = vperm.xlu0 %1814, %v1545_v41  }
  0x43   :  { %755 = vperm.xlu1 %1815, %v1546_v40   ;;  %p1859_p3 = por %p1858_p2, %p1857_p1 }
  0x45   :  { %p1860_p4 = pnand %p1859_p3, %p1853_p0 }
  0x46   :  { %740 = vperm.xlu0 %1814, %v1543_v43  }
  0x47   :  { %745 = vperm.xlu1 %1815, %v1544_v42  }
  0x4a   :  { %730 = vperm.xlu0 %1814, %v1541_v45  }
  0x4b   :  { %735 = vperm.xlu1 %1815, %v1542_v44  }
  0x4e   :  { %720 = vperm.xlu0 %1814, %v1539_v47  }
  0x4f   :  { %725 = vperm.xlu1 %1815, %v1540_v46  }
  0x52   :  { %917 = vperm.xlu0 %1814, %v1569_v49  }
  0x53   :  { %922 = vperm.xlu1 %1815, %v1570_v48  }
  0x56   :  { %907 = vperm.xlu0 %1814, %v1567_v51  }
  0x57   :  { %912 = vperm.xlu1 %1815, %v1568_v50  }
  0x5a   :  { %897 = vperm.xlu0 %1814, %v1565_v53   ;;  %v1821_v53 = vld [vmem:[%s2282_s3 + $0x8] sm:$0xff]  }
  0x5b   :  { %902 = vperm.xlu1 %1815, %v1566_v52  }
  0x5e   :  { %887 = vperm.xlu0 %1814, %v1563_v55   ;;  %v1823_v55 = vld [vmem:[%s2282_s3 + $0x18] sm:$0xff]  }
  0x5f   :  { %892 = vperm.xlu1 %1815, %v1564_v54   ;;  %v1822_v54 = vld [vmem:[%s2282_s3 + $0x10] sm:$0xff]  }
  0x62   :  { %1084 = vperm.xlu0 %1814, %v1593_v57  }
  0x63   :  { %1089 = vperm.xlu1 %1815, %v1594_v56   ;;  %v1824_v56 = vld [vmem:[%s2282_s3 + $0x20] sm:$0xff]  }
  0x64   :  { %1723 = vmatprep.mubr.msk.bf16.mxu0 %vm276_vm1, %v1824_v56 }
  0x66   :  { %1074 = vperm.xlu0 %1814, %v1591_v59  }
  0x67   :  { %1079 = vperm.xlu1 %1815, %v1592_v58  }
  0x6a   :  { %1064 = vperm.xlu0 %1814, %v1589_v61  }
  0x6b   :  { %1069 = vperm.xlu1 %1815, %v1590_v60  }
  0x6e   :  { %1054 = vperm.xlu0 %1814, %v1587_v63  }
  0x6f   :  { %1059 = vperm.xlu1 %1815, %v1588_v62  }
  0x72   :  { %1221 = vperm.xlu0 %1814, %v1611_v2  }
  0x73   :  { %1226 = vperm.xlu1 %1815, %v1612_v1  }
  0x76   :  { %1231 = vperm.xlu0 %1814, %v1613_v4  }
  0x77   :  { %1236 = vperm.xlu1 %1815, %v1614_v3  }
  0x7a   :  { %1374 = vperm.xlu0 %1814, %v1364_v6  }
  0x7b   :  { %1379 = vperm.xlu1 %1815, %v1365_v5  }
  0x7d   :  { %v70_v18 = vpop.permute.xlu1 %69  ;;  %v80_v19 = vpop.permute.xlu0 %79 }
  0x7e   :  { %1241 = vperm.xlu0 %1814, %v1615_v8  }
  0x7f   :  { %1384 = vperm.xlu1 %1815, %v1366_v7  }
  0x81   :  { %v85_v24 = vpop.permute.xlu0 %84 }
  0x82   :  { %1246 = vperm.xlu0 %1814, %v1616_v10   ;;  %v75_v22 = vpop.permute.xlu1 %74 }
  0x83   :  { %1389 = vperm.xlu1 %1815, %v1367_v9  }
  0x85   :  { %v60_v32 = vpop.permute.xlu0 %59 }
  0x86   :  { %1251 = vperm.xlu0 %1814, %v1617_v12   ;;  %v65_v28 = vpop.permute.xlu1 %64 }
  0x87   :  { %1394 = vperm.xlu1 %1815, %v1368_v11  }
  0x89   :  { %v50_v46 = vpop.permute.xlu0 %49 }
  0x8a   :  { %1256 = vperm.xlu0 %1814, %v1618_v14   ;;  %v55_v42 = vpop.permute.xlu1 %54 }
  0x8b   :  { %1399 = vperm.xlu1 %1815, %v1369_v13  }
  0x8d   :  { %v249_v59 = vpop.permute.xlu0 %248 }
  0x8e   :  { %1404 = vperm.xlu0 %1814, %v1370_v16   ;;  %v254_v57 = vpop.permute.xlu1 %253 }
  0x8f   :  { %1409 = vperm.xlu1 %1815, %v1371_v15  }
  0x91   :  { %v239_v0 = vpop.permute.xlu0 %238 }
  0x92   :  { %v244_v62 = vpop.permute.xlu1 %243 }
  0x95   :  { %v229_v8 = vpop.permute.xlu0 %228 }
  0x96   :  { %v234_v4 = vpop.permute.xlu1 %233 }
  0xcd   :  { %v1693_v17 = vpop.f32.mrf.mxu0 }
  0xce   :  { %v166_v38 = vadd.f32 %v1693_v17, %v60_v32  ;;  %v1828_v32 = vld [vmem:[%s2282_s3 + $0x40] sm:$0xff]  }
  0xcf   :  { %v157_v20 = vpop.f32.mrf.mxu0 }
  0xd0   :  { %v190_v47 = vmax.f32 %v166_v38, 0.0  ;;  %v158_v48 = vadd.f32 %v157_v20, %v50_v46 }
  0xd1   :  { %v1694_v21 = vpop.f32.mrf.mxu0 }
  0xd2   :  { %v169_v34 = vadd.f32 %v1694_v21, %v65_v28  ;;  %v188_v51 = vmax.f32 %v158_v48, 0.0 }
  0xd3   :  { %v160_v23 = vpop.f32.mrf.mxu0 }
  0xd4   :  { %v191_v43 = vmax.f32 %v169_v34, 0.0  ;;  %v161_v44 = vadd.f32 %v160_v23, %v55_v42 }
  0xd5   :  { %v1697_v25 = vpop.f32.mrf.mxu0 }
  0xd6   :  { %v182_v27 = vadd.f32 %v1697_v25, %v80_v19  ;;  %v205_v49 = vpack.c.bf16 %v191_v43, %v190_v47  ;;  %v189_v50 = vmax.f32 %v161_v44, 0.0 }
  0xd7   :  { %v173_v26 = vpop.f32.mrf.mxu0 }
  0xd8   :  { %v174_v30 = vadd.f32 %v173_v26, %v70_v18  ;;  %v194_v35 = vmax.f32 %v182_v27, 0.0  ;;  %v204_v52 = vpack.c.bf16 %v189_v50, %v188_v51  ;;  %v224_v18 = vpop.permute.xlu1 %223 }
  0xd9   :  { %v1698_v29 = vpop.f32.mrf.mxu0 }
  0xda   :  { %v185_v31 = vadd.f32 %v1698_v29, %v85_v24  ;;  %v192_v39 = vmax.f32 %v174_v30, 0.0  ;;  %v1825_v29 = vld [vmem:[%s2282_s3 + $0x28] sm:$0xff]   ;;  %v1826_v30 = vld [vmem:[%s2282_s3 + $0x30] sm:$0xff]  }
  0xdb   :  { %v176_v33 = vpop.f32.mrf.mxu0 }
  0xdc   :  { %v195_v36 = vmax.f32 %v185_v31, 0.0  ;;  %v177_v37 = vadd.f32 %v176_v33, %v75_v22  ;;  %v219_v22 = vpop.permute.xlu0 %218  ;;  %v1827_v31 = vld [vmem:[%s2282_s3 + $0x38] sm:$0xff]   ;;  %v422_v33 = vpop.permute.xlu1 %421 }
  0xde   :  { %v193_v40 = vmax.f32 %v177_v37, 0.0  ;;  %v207_v41 = vpack.c.bf16 %v195_v36, %v194_v35 }
  0xe0   :  { %v206_v45 = vpack.c.bf16 %v193_v40, %v192_v39  ;;  %1699 = vmatprep.subr.bf16.mxu1 %v207_v41  ;;  %v417_v35 = vpop.permute.xlu0 %416  ;;  %v412_v38 = vpop.permute.xlu1 %411 }
  0xe1   :  { %1700 = vmatpush3.bf16.msra.mxu1 %v207_v41 }
  0xe2   :  { %1701 = vmatprep.subr.bf16.mxu1 %v206_v45 }
  0xe4   :  { %v407_v40 = vpop.permute.xlu0 %406  ;;  %v402_v44 = vpop.permute.xlu1 %401 }
  0xe5   :  { %1702 = vmatpush3.bf16.msra.mxu1 %v206_v45 }
  0xe6   :  { %1703 = vmatprep.subr.bf16.mxu1 %v205_v49 }
  0xe8   :  { %v397_v48 = vpop.permute.xlu0 %396 }
  0xe9   :  { %1704 = vmatpush3.bf16.msra.mxu1 %v205_v49 }
  0xea   :  { %1705 = vmatprep.subr.bf16.mxu1 %v204_v52 }
  0xed   :  { %1706 = vmatpush3.bf16.msra.mxu1 %v204_v52 }
  0xf0   :  { %1708 = vmatmul.mubr.msk.bf16.vlgmr.msra.gmra.mxu1 %vm276_vm1, %v1821_v53 }
  0xf1   :  { %1711 = vmatprep.mubr.msk.bf16.mxu1 %vm276_vm1, %v1822_v54 }
  0xf8   :  { %1712 = vmatmul.mubr.msk.bf16.gmra.mxu1 %vm276_vm1, %v1823_v55 }
  0xf9   :  { %1739 = vmatprep.mubr.msk.bf16.mxu1 %vm276_vm1, %v1828_v32 }
 0x1b0   :  { %v1709_v58 = vpop.f32.mrf.mxu1 }
 0x1b1   :  { %v332_v14 = vadd.f32 %v1709_v58, %v229_v8  ;;  %v392_v58 = vpop.permute.xlu1 %391  ;;  %v1832_v8 = vld [vmem:[%s2282_s3 + $0x60] sm:$0xff]  }
 0x1b2   :  { %v323_v60 = vpop.f32.mrf.mxu1 }
 0x1b3   :  { %v356_v23 = vmax.f32 %v332_v14, 0.0  ;;  %v324_v24 = vadd.f32 %v323_v60, %v219_v22 }
 0x1b4   :  { %v1710_v61 = vpop.f32.mrf.mxu1 }
 0x1b5   :  { %v335_v10 = vadd.f32 %v1710_v61, %v234_v4  ;;  %v354_v27 = vmax.f32 %v324_v24, 0.0 }
 0x1b6   :  { %v326_v63 = vpop.f32.mrf.mxu1 }
 0x1b7   :  { %v357_v19 = vmax.f32 %v335_v10, 0.0  ;;  %v327_v20 = vadd.f32 %v326_v63, %v224_v18 }
 0x1b8   :  { %v1713_v1 = vpop.f32.mrf.mxu1 }
 0x1b9   :  { %v348_v3 = vadd.f32 %v1713_v1, %v249_v59  ;;  %v372_v25 = vpack.c.bf16 %v357_v19, %v356_v23  ;;  %v355_v26 = vmax.f32 %v327_v20, 0.0 }
 0x1ba   :  { %v339_v2 = vpop.f32.mrf.mxu1 }
 0x1bb   :  { %v340_v6 = vadd.f32 %v339_v2, %v239_v0  ;;  %v360_v11 = vmax.f32 %v348_v3, 0.0  ;;  %v371_v28 = vpack.c.bf16 %v355_v26, %v354_v27 }
 0x1bc   :  { %v1714_v5 = vpop.f32.mrf.mxu1 }
 0x1bd   :  { %v351_v7 = vadd.f32 %v1714_v5, %v254_v57  ;;  %v358_v15 = vmax.f32 %v340_v6, 0.0  ;;  %v1829_v5 = vld [vmem:[%s2282_s3 + $0x48] sm:$0xff]   ;;  %v1830_v6 = vld [vmem:[%s2282_s3 + $0x50] sm:$0xff]  }
 0x1be   :  { %v342_v9 = vpop.f32.mrf.mxu1 }
 0x1bf   :  { %v361_v12 = vmax.f32 %v351_v7, 0.0  ;;  %v343_v13 = vadd.f32 %v342_v9, %v244_v62  ;;  %v387_v62 = vpop.permute.xlu0 %386  ;;  %v1831_v7 = vld [vmem:[%s2282_s3 + $0x58] sm:$0xff]   ;;  %v589_v9 = vpop.permute.xlu1 %588 }
 0x1c1   :  { %v374_v16 = vpack.c.bf16 %v361_v12, %v360_v11  ;;  %v359_v17 = vmax.f32 %v343_v13, 0.0 }
 0x1c3   :  { %v373_v21 = vpack.c.bf16 %v359_v17, %v358_v15  ;;  %1715 = vmatprep.subr.bf16.mxu0 %v374_v16  ;;  %v584_v11 = vpop.permute.xlu0 %583  ;;  %v579_v14 = vpop.permute.xlu1 %578 }
 0x1c4   :  { %1716 = vmatpush3.bf16.msra.mxu0 %v374_v16 }
 0x1c5   :  { %1717 = vmatprep.subr.bf16.mxu0 %v373_v21 }
 0x1c7   :  { %v574_v16 = vpop.permute.xlu0 %573  ;;  %v569_v20 = vpop.permute.xlu1 %568 }
 0x1c8   :  { %1718 = vmatpush3.bf16.msra.mxu0 %v373_v21 }
 0x1c9   :  { %1719 = vmatprep.subr.bf16.mxu0 %v372_v25 }
 0x1cb   :  { %v564_v24 = vpop.permute.xlu0 %563 }
 0x1cc   :  { %1720 = vmatpush3.bf16.msra.mxu0 %v372_v25 }
 0x1cd   :  { %1721 = vmatprep.subr.bf16.mxu0 %v371_v28 }
 0x1d0   :  { %1722 = vmatpush3.bf16.msra.mxu0 %v371_v28 }
 0x1d3   :  { %1724 = vmatmul.mubr.msk.bf16.vlgmr.msra.gmra.mxu0 %vm276_vm1, %v1825_v29 }
 0x1d4   :  { %1727 = vmatprep.mubr.msk.bf16.mxu0 %vm276_vm1, %v1826_v30 }
 0x1db   :  { %1728 = vmatmul.mubr.msk.bf16.gmra.mxu0 %vm276_vm1, %v1827_v31 }
 0x1dc   :  { %1755 = vmatprep.mubr.msk.bf16.mxu0 %vm276_vm1, %v1832_v8 }
 0x293   :  { %v1725_v34 = vpop.f32.mrf.mxu0 }
 0x294   :  { %v499_v54 = vadd.f32 %v1725_v34, %v397_v48  ;;  %v559_v34 = vpop.permute.xlu1 %558  ;;  %v1836_v48 = vld [vmem:[%s2282_s3 + $0x80] sm:$0xff]  }
 0x295   :  { %v490_v36 = vpop.f32.mrf.mxu0 }
 0x296   :  { %v523_v63 = vmax.f32 %v499_v54, 0.0  ;;  %v491_v0 = vadd.f32 %v490_v36, %v387_v62 }
 0x297   :  { %v1726_v37 = vpop.f32.mrf.mxu0 }
 0x298   :  { %v502_v50 = vadd.f32 %v1726_v37, %v402_v44  ;;  %v521_v3 = vmax.f32 %v491_v0, 0.0 }
 0x299   :  { %v493_v39 = vpop.f32.mrf.mxu0 }
 0x29a   :  { %v524_v59 = vmax.f32 %v502_v50, 0.0  ;;  %v494_v60 = vadd.f32 %v493_v39, %v392_v58 }
 0x29b   :  { %v1729_v41 = vpop.f32.mrf.mxu0 }
 0x29c   :  { %v515_v43 = vadd.f32 %v1729_v41, %v417_v35  ;;  %v539_v1 = vpack.c.bf16 %v524_v59, %v523_v63  ;;  %v522_v2 = vmax.f32 %v494_v60, 0.0 }
 0x29d   :  { %v506_v42 = vpop.f32.mrf.mxu0 }
 0x29e   :  { %v507_v46 = vadd.f32 %v506_v42, %v407_v40  ;;  %v527_v51 = vmax.f32 %v515_v43, 0.0  ;;  %v538_v4 = vpack.c.bf16 %v522_v2, %v521_v3 }
 0x29f   :  { %v1730_v45 = vpop.f32.mrf.mxu0 }
 0x2a0   :  { %v518_v47 = vadd.f32 %v1730_v45, %v422_v33  ;;  %v525_v55 = vmax.f32 %v507_v46, 0.0  ;;  %v1833_v45 = vld [vmem:[%s2282_s3 + $0x68] sm:$0xff]   ;;  %v1834_v46 = vld [vmem:[%s2282_s3 + $0x70] sm:$0xff]  }
 0x2a1   :  { %v509_v49 = vpop.f32.mrf.mxu0 }
 0x2a2   :  { %v528_v52 = vmax.f32 %v518_v47, 0.0  ;;  %v510_v53 = vadd.f32 %v509_v49, %v412_v38  ;;  %v554_v38 = vpop.permute.xlu0 %553  ;;  %v1835_v47 = vld [vmem:[%s2282_s3 + $0x78] sm:$0xff]   ;;  %v756_v49 = vpop.permute.xlu1 %755 }
 0x2a4   :  { %v541_v56 = vpack.c.bf16 %v528_v52, %v527_v51  ;;  %v526_v57 = vmax.f32 %v510_v53, 0.0 }
 0x2a6   :  { %v540_v61 = vpack.c.bf16 %v526_v57, %v525_v55  ;;  %1731 = vmatprep.subr.bf16.mxu1 %v541_v56  ;;  %v751_v51 = vpop.permute.xlu0 %750  ;;  %v746_v54 = vpop.permute.xlu1 %745 }
 0x2a7   :  { %1732 = vmatpush3.bf16.msra.mxu1 %v541_v56 }
 0x2a8   :  { %1733 = vmatprep.subr.bf16.mxu1 %v540_v61 }
 0x2aa   :  { %v741_v56 = vpop.permute.xlu0 %740  ;;  %v736_v60 = vpop.permute.xlu1 %735 }
 0x2ab   :  { %1734 = vmatpush3.bf16.msra.mxu1 %v540_v61 }
 0x2ac   :  { %1735 = vmatprep.subr.bf16.mxu1 %v539_v1 }
 0x2ae   :  { %v731_v0 = vpop.permute.xlu0 %730 }
 0x2af   :  { %1736 = vmatpush3.bf16.msra.mxu1 %v539_v1 }
 0x2b0   :  { %1737 = vmatprep.subr.bf16.mxu1 %v538_v4 }
 0x2b3   :  { %1738 = vmatpush3.bf16.msra.mxu1 %v538_v4 }
 0x2b6   :  { %1740 = vmatmul.mubr.msk.bf16.vlgmr.msra.gmra.mxu1 %vm276_vm1, %v1829_v5 }
 0x2b7   :  { %1743 = vmatprep.mubr.msk.bf16.mxu1 %vm276_vm1, %v1830_v6 }
 0x2be   :  { %1744 = vmatmul.mubr.msk.bf16.gmra.mxu1 %vm276_vm1, %v1831_v7 }
 0x2bf   :  { %1771 = vmatprep.mubr.msk.bf16.mxu1 %vm276_vm1, %v1836_v48 }
 0x376   :  { %v1741_v10 = vpop.f32.mrf.mxu1 }
 0x377   :  { %v666_v30 = vadd.f32 %v1741_v10, %v564_v24  ;;  %v726_v10 = vpop.permute.xlu1 %725  ;;  %v1840_v24 = vld [vmem:[%s2282_s3 + $0xa0] sm:$0xff]  }
 0x378   :  { %v657_v12 = vpop.f32.mrf.mxu1 }
 0x379   :  { %v690_v39 = vmax.f32 %v666_v30, 0.0  ;;  %v658_v40 = vadd.f32 %v657_v12, %v554_v38 }
 0x37a   :  { %v1742_v13 = vpop.f32.mrf.mxu1 }
 0x37b   :  { %v669_v26 = vadd.f32 %v1742_v13, %v569_v20  ;;  %v688_v43 = vmax.f32 %v658_v40, 0.0 }
 0x37c   :  { %v660_v15 = vpop.f32.mrf.mxu1 }
 0x37d   :  { %v691_v35 = vmax.f32 %v669_v26, 0.0  ;;  %v661_v36 = vadd.f32 %v660_v15, %v559_v34 }
 0x37e   :  { %v1745_v17 = vpop.f32.mrf.mxu1 }
 0x37f   :  { %v682_v19 = vadd.f32 %v1745_v17, %v584_v11  ;;  %v706_v41 = vpack.c.bf16 %v691_v35, %v690_v39  ;;  %v689_v42 = vmax.f32 %v661_v36, 0.0 }
 0x380   :  { %v673_v18 = vpop.f32.mrf.mxu1 }
 0x381   :  { %v674_v22 = vadd.f32 %v673_v18, %v574_v16  ;;  %v694_v27 = vmax.f32 %v682_v19, 0.0  ;;  %v705_v44 = vpack.c.bf16 %v689_v42, %v688_v43 }
 0x382   :  { %v1746_v21 = vpop.f32.mrf.mxu1 }
 0x383   :  { %v685_v23 = vadd.f32 %v1746_v21, %v589_v9  ;;  %v692_v31 = vmax.f32 %v674_v22, 0.0  ;;  %v1837_v21 = vld [vmem:[%s2282_s3 + $0x88] sm:$0xff]   ;;  %v1838_v22 = vld [vmem:[%s2282_s3 + $0x90] sm:$0xff]  }
 0x384   :  { %v676_v25 = vpop.f32.mrf.mxu1 }
 0x385   :  { %v695_v28 = vmax.f32 %v685_v23, 0.0  ;;  %v677_v29 = vadd.f32 %v676_v25, %v579_v14  ;;  %v721_v14 = vpop.permute.xlu0 %720  ;;  %v1839_v23 = vld [vmem:[%s2282_s3 + $0x98] sm:$0xff]   ;;  %v923_v25 = vpop.permute.xlu1 %922 }
 0x387   :  { %v708_v32 = vpack.c.bf16 %v695_v28, %v694_v27  ;;  %v693_v33 = vmax.f32 %v677_v29, 0.0 }
 0x389   :  { %v707_v37 = vpack.c.bf16 %v693_v33, %v692_v31  ;;  %1747 = vmatprep.subr.bf16.mxu0 %v708_v32  ;;  %v918_v27 = vpop.permute.xlu0 %917  ;;  %v913_v30 = vpop.permute.xlu1 %912 }
 0x38a   :  { %1748 = vmatpush3.bf16.msra.mxu0 %v708_v32 }
 0x38b   :  { %1749 = vmatprep.subr.bf16.mxu0 %v707_v37 }
 0x38d   :  { %v908_v32 = vpop.permute.xlu0 %907  ;;  %v903_v36 = vpop.permute.xlu1 %902 }
 0x38e   :  { %1750 = vmatpush3.bf16.msra.mxu0 %v707_v37 }
 0x38f   :  { %1751 = vmatprep.subr.bf16.mxu0 %v706_v41 }
 0x391   :  { %v898_v40 = vpop.permute.xlu0 %897 }
 0x392   :  { %1752 = vmatpush3.bf16.msra.mxu0 %v706_v41 }
 0x393   :  { %1753 = vmatprep.subr.bf16.mxu0 %v705_v44 }
 0x396   :  { %1754 = vmatpush3.bf16.msra.mxu0 %v705_v44 }
 0x399   :  { %1756 = vmatmul.mubr.msk.bf16.vlgmr.msra.gmra.mxu0 %vm276_vm1, %v1833_v45 }
 0x39a   :  { %1759 = vmatprep.mubr.msk.bf16.mxu0 %vm276_vm1, %v1834_v46 }
 0x3a1   :  { %1760 = vmatmul.mubr.msk.bf16.gmra.mxu0 %vm276_vm1, %v1835_v47 }
 0x3a2   :  { %1787 = vmatprep.mubr.msk.bf16.mxu0 %vm276_vm1, %v1840_v24 }
 0x459   :  { %v1757_v50 = vpop.f32.mrf.mxu0 }
 0x45a   :  { %v833_v6 = vadd.f32 %v1757_v50, %v731_v0  ;;  %v893_v50 = vpop.permute.xlu1 %892  ;;  %v1844_v0 = vld [vmem:[%s2282_s3 + $0xc0] sm:$0xff]  }
 0x45b   :  { %v824_v52 = vpop.f32.mrf.mxu0 }
 0x45c   :  { %v857_v15 = vmax.f32 %v833_v6, 0.0  ;;  %v825_v16 = vadd.f32 %v824_v52, %v721_v14 }
 0x45d   :  { %v1758_v53 = vpop.f32.mrf.mxu0 }
 0x45e   :  { %v836_v2 = vadd.f32 %v1758_v53, %v736_v60  ;;  %v855_v19 = vmax.f32 %v825_v16, 0.0 }
 0x45f   :  { %v827_v55 = vpop.f32.mrf.mxu0 }
 0x460   :  { %v858_v11 = vmax.f32 %v836_v2, 0.0  ;;  %v828_v12 = vadd.f32 %v827_v55, %v726_v10 }
 0x461   :  { %v1761_v57 = vpop.f32.mrf.mxu0 }
 0x462   :  { %v849_v59 = vadd.f32 %v1761_v57, %v751_v51  ;;  %v873_v17 = vpack.c.bf16 %v858_v11, %v857_v15  ;;  %v856_v18 = vmax.f32 %v828_v12, 0.0 }
 0x463   :  { %v840_v58 = vpop.f32.mrf.mxu0 }
 0x464   :  { %v841_v62 = vadd.f32 %v840_v58, %v741_v56  ;;  %v861_v3 = vmax.f32 %v849_v59, 0.0  ;;  %v872_v20 = vpack.c.bf16 %v856_v18, %v855_v19 }
 0x465   :  { %v1762_v61 = vpop.f32.mrf.mxu0 }
 0x466   :  { %v852_v63 = vadd.f32 %v1762_v61, %v756_v49  ;;  %v859_v7 = vmax.f32 %v841_v62, 0.0  ;;  %v1841_v61 = vld [vmem:[%s2282_s3 + $0xa8] sm:$0xff]   ;;  %v1842_v62 = vld [vmem:[%s2282_s3 + $0xb0] sm:$0xff]  }
 0x467   :  { %v843_v1 = vpop.f32.mrf.mxu0 }
 0x468   :  { %v862_v4 = vmax.f32 %v852_v63, 0.0  ;;  %v844_v5 = vadd.f32 %v843_v1, %v746_v54  ;;  %v888_v54 = vpop.permute.xlu0 %887  ;;  %v1843_v63 = vld [vmem:[%s2282_s3 + $0xb8] sm:$0xff]   ;;  %v1090_v1 = vpop.permute.xlu1 %1089 }
 0x46a   :  { %v875_v8 = vpack.c.bf16 %v862_v4, %v861_v3  ;;  %v860_v9 = vmax.f32 %v844_v5, 0.0 }
 0x46c   :  { %v874_v13 = vpack.c.bf16 %v860_v9, %v859_v7  ;;  %1763 = vmatprep.subr.bf16.mxu1 %v875_v8  ;;  %v1085_v3 = vpop.permute.xlu0 %1084  ;;  %v1080_v6 = vpop.permute.xlu1 %1079 }
 0x46d   :  { %1764 = vmatpush3.bf16.msra.mxu1 %v875_v8 }
 0x46e   :  { %1765 = vmatprep.subr.bf16.mxu1 %v874_v13 }
 0x470   :  { %v1075_v8 = vpop.permute.xlu0 %1074  ;;  %v1070_v12 = vpop.permute.xlu1 %1069 }
 0x471   :  { %1766 = vmatpush3.bf16.msra.mxu1 %v874_v13 }
 0x472   :  { %1767 = vmatprep.subr.bf16.mxu1 %v873_v17 }
 0x474   :  { %v1065_v16 = vpop.permute.xlu0 %1064 }
 0x475   :  { %1768 = vmatpush3.bf16.msra.mxu1 %v873_v17 }
 0x476   :  { %1769 = vmatprep.subr.bf16.mxu1 %v872_v20 }
 0x479   :  { %1770 = vmatpush3.bf16.msra.mxu1 %v872_v20 }
 0x47c   :  { %1772 = vmatmul.mubr.msk.bf16.vlgmr.msra.gmra.mxu1 %vm276_vm1, %v1837_v21 }
 0x47d   :  { %1775 = vmatprep.mubr.msk.bf16.mxu1 %vm276_vm1, %v1838_v22 }
 0x484   :  { %1776 = vmatmul.mubr.msk.bf16.gmra.mxu1 %vm276_vm1, %v1839_v23 }
 0x485   :  { %1803 = vmatprep.mubr.msk.bf16.mxu1 %vm276_vm1, %v1844_v0 }
 0x53c   :  { %v1773_v26 = vpop.f32.mrf.mxu1 }
 0x53d   :  { %v1000_v46 = vadd.f32 %v1773_v26, %v898_v40  ;;  %v1060_v26 = vpop.permute.xlu1 %1059 }
 0x53e   :  { %v991_v28 = vpop.f32.mrf.mxu1 }
 0x53f   :  { %v1024_v55 = vmax.f32 %v1000_v46, 0.0  ;;  %v992_v56 = vadd.f32 %v991_v28, %v888_v54 }
 0x540   :  { %v1774_v29 = vpop.f32.mrf.mxu1 }
 0x541   :  { %v1003_v42 = vadd.f32 %v1774_v29, %v903_v36  ;;  %v1022_v59 = vmax.f32 %v992_v56, 0.0 }
 0x542   :  { %v994_v31 = vpop.f32.mrf.mxu1 }
 0x543   :  { %v1025_v51 = vmax.f32 %v1003_v42, 0.0  ;;  %v995_v52 = vadd.f32 %v994_v31, %v893_v50 }
 0x544   :  { %v1777_v33 = vpop.f32.mrf.mxu1 }
 0x545   :  { %v1016_v35 = vadd.f32 %v1777_v33, %v918_v27  ;;  %v1040_v57 = vpack.c.bf16 %v1025_v51, %v1024_v55  ;;  %v1023_v58 = vmax.f32 %v995_v52, 0.0 }
 0x546   :  { %v1007_v34 = vpop.f32.mrf.mxu1 }
 0x547   :  { %v1008_v38 = vadd.f32 %v1007_v34, %v908_v32  ;;  %v1028_v43 = vmax.f32 %v1016_v35, 0.0  ;;  %v1039_v60 = vpack.c.bf16 %v1023_v58, %v1022_v59 }
 0x548   :  { %v1778_v37 = vpop.f32.mrf.mxu1 }
 0x549   :  { %v1019_v39 = vadd.f32 %v1778_v37, %v923_v25  ;;  %v1026_v47 = vmax.f32 %v1008_v38, 0.0  ;;  %v1845_v37 = vld [vmem:[%s2282_s3 + $0xc8] sm:$0xff]   ;;  %v1846_v38 = vld [vmem:[%s2282_s3 + $0xd0] sm:$0xff]  }
 0x54a   :  { %v1010_v41 = vpop.f32.mrf.mxu1 }
 0x54b   :  { %v1029_v44 = vmax.f32 %v1019_v39, 0.0  ;;  %v1011_v45 = vadd.f32 %v1010_v41, %v913_v30  ;;  %v1055_v30 = vpop.permute.xlu0 %1054  ;;  %v1847_v39 = vld [vmem:[%s2282_s3 + $0xd8] sm:$0xff]   ;;  %v1227_v41 = vpop.permute.xlu1 %1226 }
 0x54d   :  { %v1042_v48 = vpack.c.bf16 %v1029_v44, %v1028_v43  ;;  %v1027_v49 = vmax.f32 %v1011_v45, 0.0 }
 0x54f   :  { %v1041_v53 = vpack.c.bf16 %v1027_v49, %v1026_v47  ;;  %1779 = vmatprep.subr.bf16.mxu0 %v1042_v48  ;;  %v1222_v40 = vpop.permute.xlu0 %1221  ;;  %v1237_v43 = vpop.permute.xlu1 %1236 }
 0x550   :  { %1780 = vmatpush3.bf16.msra.mxu0 %v1042_v48 }
 0x551   :  { %1781 = vmatprep.subr.bf16.mxu0 %v1041_v53 }
 0x553   :  { %v1232_v42 = vpop.permute.xlu0 %1231  ;;  %v1380_v45 = vpop.permute.xlu1 %1379 }
 0x554   :  { %1782 = vmatpush3.bf16.msra.mxu0 %v1041_v53 }
 0x555   :  { %1783 = vmatprep.subr.bf16.mxu0 %v1040_v57 }
 0x557   :  { %v1375_v44 = vpop.permute.xlu0 %1374  ;;  %v1385_v47 = vpop.permute.xlu1 %1384 }
 0x558   :  { %1784 = vmatpush3.bf16.msra.mxu0 %v1040_v57 }
 0x559   :  { %1785 = vmatprep.subr.bf16.mxu0 %v1039_v60 }
 0x55b   :  { %v1242_v46 = vpop.permute.xlu0 %1241  ;;  %v1390_v50 = vpop.permute.xlu1 %1389 }
 0x55c   :  { %1786 = vmatpush3.bf16.msra.mxu0 %v1039_v60 }
 0x55f   :  { %1788 = vmatmul.mubr.msk.bf16.vlgmr.msra.gmra.mxu0 %vm276_vm1, %v1841_v61  ;;  %v1247_v48 = vpop.permute.xlu0 %1246  ;;  %v1395_v61 = vpop.permute.xlu1 %1394 }
 0x560   :  { %1791 = vmatprep.mubr.msk.bf16.mxu0 %vm276_vm1, %v1842_v62 }
 0x563   :  { %v1252_v57 = vpop.permute.xlu0 %1251 }
 0x567   :  { %1792 = vmatmul.mubr.msk.bf16.gmra.mxu0 %vm276_vm1, %v1843_v63 }
 0x61f   :  { %v1789_v2 = vpop.f32.mrf.mxu0 }
 0x620   :  { %v1167_v22 = vadd.f32 %v1789_v2, %v1065_v16 }
 0x621   :  { %v1158_v4 = vpop.f32.mrf.mxu0 }
 0x622   :  { %v1191_v31 = vmax.f32 %v1167_v22, 0.0  ;;  %v1159_v32 = vadd.f32 %v1158_v4, %v1055_v30 }
 0x623   :  { %v1790_v5 = vpop.f32.mrf.mxu0 }
 0x624   :  { %v1170_v18 = vadd.f32 %v1790_v5, %v1070_v12  ;;  %v1189_v35 = vmax.f32 %v1159_v32, 0.0 }
 0x625   :  { %v1161_v7 = vpop.f32.mrf.mxu0 }
 0x626   :  { %v1192_v27 = vmax.f32 %v1170_v18, 0.0  ;;  %v1162_v28 = vadd.f32 %v1161_v7, %v1060_v26  ;;  %v1257_v7 = vpop.permute.xlu0 %1256 }
 0x627   :  { %v1793_v9 = vpop.f32.mrf.mxu0 }
 0x628   :  { %v1183_v11 = vadd.f32 %v1793_v9, %v1085_v3  ;;  %v1207_v33 = vpack.c.bf16 %v1192_v27, %v1191_v31  ;;  %v1190_v34 = vmax.f32 %v1162_v28, 0.0 }
 0x629   :  { %v1174_v10 = vpop.f32.mrf.mxu0 }
 0x62a   :  { %v1175_v14 = vadd.f32 %v1174_v10, %v1075_v8  ;;  %v1195_v19 = vmax.f32 %v1183_v11, 0.0  ;;  %v1206_v36 = vpack.c.bf16 %v1190_v34, %v1189_v35 }
 0x62b   :  { %v1794_v13 = vpop.f32.mrf.mxu0 }
 0x62c   :  { %v1186_v15 = vadd.f32 %v1794_v13, %v1090_v1  ;;  %v1193_v23 = vmax.f32 %v1175_v14, 0.0  ;;  %v1400_v14 = vpop.permute.xlu1 %1399 }
 0x62d   :  { %v1177_v17 = vpop.f32.mrf.mxu0 }
 0x62e   :  { %v1196_v20 = vmax.f32 %v1186_v15, 0.0  ;;  %v1178_v21 = vadd.f32 %v1177_v17, %v1080_v6 }
 0x630   :  { %v1209_v24 = vpack.c.bf16 %v1196_v20, %v1195_v19  ;;  %v1194_v25 = vmax.f32 %v1178_v21, 0.0  ;;  %v1410_v30 = vpop.permute.xlu1 %1409 }
 0x632   :  { %v1208_v29 = vpack.c.bf16 %v1194_v25, %v1193_v23  ;;  %1795 = vmatprep.subr.bf16.mxu1 %v1209_v24  ;;  %v1405_v25 = vpop.permute.xlu0 %1404 }
 0x633   :  { %1796 = vmatpush3.bf16.msra.mxu1 %v1209_v24 }
 0x634   :  { %1797 = vmatprep.subr.bf16.mxu1 %v1208_v29 }
 0x637   :  { %1798 = vmatpush3.bf16.msra.mxu1 %v1208_v29 }
 0x638   :  { %1799 = vmatprep.subr.bf16.mxu1 %v1207_v33 }
 0x63b   :  { %1800 = vmatpush3.bf16.msra.mxu1 %v1207_v33 }
 0x63c   :  { %1801 = vmatprep.subr.bf16.mxu1 %v1206_v36 }
 0x63f   :  { %1802 = vmatpush3.bf16.msra.mxu1 %v1206_v36 }
 0x642   :  { %1804 = vmatmul.mubr.msk.bf16.vlgmr.msra.gmra.mxu1 %vm276_vm1, %v1845_v37 }
 0x643   :  { %1807 = vmatprep.mubr.msk.bf16.mxu1 %vm276_vm1, %v1846_v38 }
 0x64a   :  { %1808 = vmatmul.mubr.msk.bf16.gmra.mxu1 %vm276_vm1, %v1847_v39 }
 0x702   :  { %v1805_v49 = vpop.f32.mrf.mxu1 }
 0x703   :  { %v1334_v52 = vadd.f32 %v1805_v49, %v1232_v42 }
 0x704   :  { %v1325_v51 = vpop.f32.mrf.mxu1 }
 0x705   :  { %v1326_v53 = vadd.f32 %v1325_v51, %v1222_v40  ;;  %v1358_v59 = vmax.f32 %v1334_v52, 0.0 }
 0x706   :  { %v1806_v54 = vpop.f32.mrf.mxu1 }
 0x707   :  { %v1356_v55 = vmax.f32 %v1326_v53, 0.0  ;;  %v1337_v56 = vadd.f32 %v1806_v54, %v1237_v43  ;;  %v1414_v3 = vmul.f32 %v1385_v47, %v1358_v59 }
 0x708   :  { %v1328_v58 = vpop.f32.mrf.mxu1 }
 0x709   :  { %v1329_v60 = vadd.f32 %v1328_v58, %v1227_v41  ;;  %v1412_v62 = vmul.f32 %v1375_v44, %v1356_v55  ;;  %v1359_v0 = vmax.f32 %v1337_v56, 0.0  ;;  %v1424_v17 = vsel %vm1420_vm2, %v1414_v3, 0.0 }
 0x70a   :  { %v1809_v63 = vpop.f32.mrf.mxu1  ;;  %v1443_v44 = vstv %s2285_s6 }
 0x70b   :  { %v1357_v1 = vmax.f32 %v1329_v60, 0.0  ;;  %v1350_v5 = vadd.f32 %v1809_v63, %v1252_v57  ;;  %v1421_v8 = vsel %vm1420_vm2, %v1412_v62, 0.0  ;;  %v1415_v10 = vmul.f32 %v1390_v50, %v1359_v0 }
 0x70c   :  { %v1341_v2 = vpop.f32.mrf.mxu1 }
 0x70d   :  { %v1413_v4 = vmul.f32 %v1380_v45, %v1357_v1  ;;  %v1342_v6 = vadd.f32 %v1341_v2, %v1242_v46  ;;  %v1362_v18 = vmax.f32 %v1350_v5, 0.0  ;;  %v1426_v22 = vsel %vm1420_vm2, %v1415_v10, 0.0 }
 0x70e   :  { %v1810_v9 = vpop.f32.mrf.mxu1 }
 0x70f   :  { %v1422_v11 = vsel %vm1420_vm2, %v1413_v4, 0.0  ;;  %v1360_v12 = vmax.f32 %v1342_v6, 0.0  ;;  %v1353_v13 = vadd.f32 %v1810_v9, %v1257_v7  ;;  %v1418_v27 = vmul.f32 %v1405_v25, %v1362_v18 }
 0x710   :  { %v1423_v15 = vadd.f32 %v1422_v11, %v1421_v8  ;;  %v1344_v16 = vpop.f32.mrf.mxu1 }
 0x711   :  { %v1416_v19 = vmul.f32 %v1395_v61, %v1360_v12  ;;  %v1345_v20 = vadd.f32 %v1344_v16, %v1247_v48  ;;  %v1363_v23 = vmax.f32 %v1353_v13, 0.0  ;;  %v1432_v35 = vsel %vm1420_vm2, %v1418_v27, 0.0 }
 0x712   :  { %v1425_v21 = vadd.f32 %v1424_v17, %v1423_v15 }
 0x713   :  { %v1361_v24 = vmax.f32 %v1345_v20, 0.0  ;;  %v1428_v28 = vsel %vm1420_vm2, %v1416_v19, 0.0  ;;  %v1419_v32 = vmul.f32 %v1410_v30, %v1363_v23 }
 0x714   :  { %v1427_v26 = vadd.f32 %v1426_v22, %v1425_v21 }
 0x715   :  { %v1417_v29 = vmul.f32 %v1400_v14, %v1361_v24  ;;  %v1434_v37 = vsel %vm1420_vm2, %v1419_v32, 0.0 }
 0x716   :  { %v1429_v31 = vadd.f32 %v1428_v28, %v1427_v26 }
 0x717   :  { %v1430_v33 = vsel %vm1420_vm2, %v1417_v29, 0.0 }
 0x718   :  { %v1431_v34 = vadd.f32 %v1430_v33, %v1429_v31 }
 0x71a   :  { %v1433_v36 = vadd.f32 %v1432_v35, %v1431_v34 }
 0x71c   :  { %v1435_v38 = vadd.f32 %v1434_v37, %v1433_v36 }
 0x71e   :  { %v1436_v39 = vrot.slane %v1435_v38, 4 }
 0x720   :  { %v1437_v40 = vadd.f32 %v1436_v39, %v1435_v38 }
 0x722   :  { %v1438_v41 = vrot.slane %v1437_v40, 2 }
 0x724   :  { %v1439_v42 = vadd.f32 %v1438_v41, %v1437_v40 }
 0x726   :  { %v1440_v43 = vrot.slane %v1439_v42, 1 }
 0x728   :  { %v1441_v45 = vadd.f32 %v1440_v43, %v1439_v42 }
 0x72a   :  { %v1444_v46 = vadd.f32 %v1443_v44, %v1441_v45 }
 0x72c   :  { %v1627_v47 = vmul.f32 -1.442695, %v1444_v46 }
 0x72e   :  { %1848 = vpow2.f32 %v1627_v47 }
 0x73b   :  { %v1849_v48 = vpop.eup %1848 }
 0x73c   :  { %v1448_v49 = vadd.f32 1.0, %v1849_v48 }
 0x73e   :  { %1850 = vrcp.f32 %v1448_v49 }
 0x74b   :  { %v1851_v50 = vpop.eup %1850 }
 0x74c   :  { %1452 = vst.msk [vmem:[#allocation3] sm:$0x1] %vm1451_vm3, %v1851_v50 }
 0x74d   :  { %1863 = shalt.err (!%p1860_p4)
}
 0x74e   :  { %1462 = dma.vmem_to_hbm [thread:$0]  %s1460_s4, 16, %s2286_s7, [#allocation4]  }
 0x74f   :  { %1872 = dma.done.wait [#allocation4], 16  }
 0x750   :  { %1873 = vsyncadd [#allocation4], 4294967280 }
 0x751   :  { %1466 = vsyncpa [#allocation4], 1 }

</bundles_post_ra>
